<compile_context>
chip_gen: v6e
topology: v6e:2x2x1
jax: 0.10.0
libtpu: 0.0.40
codegen_flags: <defaults>
</compile_context>

<pallas_src>
import functools

import jax
import jax.numpy as jnp
from jax.experimental import pallas as pl
from jax.experimental.pallas import tpu as pltpu


# ---------------------------------------------------------------------------
# Small helpers
# ---------------------------------------------------------------------------

def _round_up(x: int, m: int) -> int:
    return (x + m - 1) // m * m


def _cdiv(a: int, b: int) -> int:
    return -(-a // b)


def _pick_tm(M: int) -> int:
    """Batch tile: multiple of 8, and >=2 blocks whenever M allows it (v7x 2xTC)."""
    if M <= 128:
        return _round_up(M, 8)
    for tm in (512, 256, 128):
        if _cdiv(M, tm) >= 2:
            return tm
    return 128


def _pick_div_tile(dim_p: int, cap: int = 512) -> int:
    """Largest multiple of 128 <= cap that divides dim_p (dim_p % 128 == 0)."""
    t = min(cap, dim_p)
    t = (t // 128) * 128
    while dim_p % t != 0:
        t -= 128
    return t


def _apply_activation(y, act):
    if act in (None, "linear", "identity", "none"):
        return y
    if act == "relu":
        return jnp.maximum(y, 0.0)
    if act == "tanh":
        return jnp.tanh(y)
    if act == "sigmoid":
        return jax.nn.sigmoid(y)
    if act == "leaky_relu":
        return jnp.where(y > 0, y, 0.01 * y)
    if act == "elu":
        return jnp.where(y > 0, y, jnp.expm1(y))
    raise ValueError(f"unsupported activation: {act!r}")


# ---------------------------------------------------------------------------
# One-time parameter prep (hoisted out of the forward hot path)
# ---------------------------------------------------------------------------

def prepare_params(params, compute_dtype=jnp.bfloat16):
    """Transpose + pad + cast once.

    params: list of (w, b) with w: (N, K) [nn.Linear convention], b: (N,).
    Returns list of (wt_p, b_p, n_out):
        wt_p: (Kp, Np) compute_dtype, K/N zero-padded to multiples of 128
        b_p : (1, Np) float32, zero-padded
        n_out: original N (needed to slice the final output)
    """
    prepped = []
    for w, b in params:
        n_out, k_in = w.shape
        kp = _round_up(k_in, 128)
        np_ = _round_up(n_out, 128)
        wt_p = jnp.pad(w.T, ((0, kp - k_in), (0, np_ - n_out))).astype(compute_dtype)
        b_p = jnp.pad(b, (0, np_ - n_out)).reshape(1, np_).astype(jnp.float32)
        prepped.append((wt_p, b_p, n_out))
    return prepped


# ---------------------------------------------------------------------------
# Fused whole-MLP kernel (all layers in one pallas_call)
# ---------------------------------------------------------------------------

def _fused_mlp_kernel(x_ref, *rest, activations):
    n_layers = len(activations)
    o_ref = rest[2 * n_layers]
    h = x_ref[...]
    for i, act in enumerate(activations):
        w_ref = rest[2 * i]
        b_ref = rest[2 * i + 1]
        # bf16 MXU feed, f32 accumulate + epilogue (VPU).
        y = jnp.dot(
            h.astype(w_ref.dtype), w_ref[...], preferred_element_type=jnp.float32
        )
        y = y + b_ref[...].astype(jnp.float32)
        h = _apply_activation(y, act)
    o_ref[...] = h.astype(o_ref.dtype)


def _fused_vmem_bytes(tm, k0p, prepped, out_dtype):
    total = 2 * tm * k0p * 4                      # x tile (double-buffered, f32)
    max_w = k0p
    for wt_p, b_p, _ in prepped:
        kip, nip = wt_p.shape
        total += 2 * kip * nip * wt_p.dtype.itemsize
        total += 2 * 8 * nip * 4                  # bias (sublane-padded)
        max_w = max(max_w, nip)
    n_last_p = prepped[-1][0].shape[1]
    total += 2 * tm * n_last_p * jnp.dtype(out_dtype).itemsize
    total += 4 * tm * max_w * 4                   # headroom for live intermediates
    return total


def _fused_forward(x_p, prepped, activations, *, tm, out_dtype):
    mp, k0p = x_p.shape
    n_last_p = prepped[-1][0].shape[1]

    in_specs = [pl.BlockSpec((tm, k0p), lambda i: (i, 0))]
    args = [x_p]
    flops = 0
    transc = 0
    bytes_accessed = mp * k0p * x_p.dtype.itemsize
    for (wt_p, b_p, _), act in zip(prepped, activations):
        kip, nip = wt_p.shape
        # Weights/bias use a constant block index -> DMA'd once, resident in VMEM.
        in_specs.append(pl.BlockSpec((kip, nip), lambda i: (0, 0)))
        in_specs.append(pl.BlockSpec((1, nip), lambda i: (0, 0)))
        args.extend([wt_p, b_p])
        flops += 2 * mp * kip * nip
        if act in ("tanh", "sigmoid", "elu"):
            transc += mp * nip
        bytes_accessed += kip * nip * wt_p.dtype.itemsize + nip * 4
    bytes_accessed += mp * n_last_p * jnp.dtype(out_dtype).itemsize

    return pl.pallas_call(
        functools.partial(_fused_mlp_kernel, activations=tuple(activations)),
        out_shape=jax.ShapeDtypeStruct((mp, n_last_p), out_dtype),
        grid_spec=pltpu.PrefetchScalarGridSpec(
            num_scalar_prefetch=0,
            grid=(mp // tm,),
            in_specs=in_specs,
            out_specs=pl.BlockSpec((tm, n_last_p), lambda i: (i, 0)),
        ),
        compiler_params=pltpu.CompilerParams(
            dimension_semantics=("parallel",),
        ),
        cost_estimate=pl.CostEstimate(
            flops=flops, transcendentals=transc, bytes_accessed=bytes_accessed
        ),
    )(*args)


# ---------------------------------------------------------------------------
# Fallback: per-layer tiled matmul with K-reduction (large layers)
# ---------------------------------------------------------------------------

def _linear_act_single_k_kernel(x_ref, w_ref, b_ref, o_ref, *, activation):
    # Single K step: no accumulator scratch, no pl.when phases.
    y = jnp.dot(
        x_ref[...].astype(w_ref.dtype), w_ref[...], preferred_element_type=jnp.float32
    )
    y = y + b_ref[...].astype(jnp.float32)
    o_ref[...] = _apply_activation(y, activation).astype(o_ref.dtype)


def _linear_act_kred_kernel(x_ref, w_ref, b_ref, o_ref, acc_ref, *, activation):
    k = pl.program_id(2)

    @pl.when(k == 0)
    def _():
        acc_ref[...] = jnp.zeros_like(acc_ref)

    acc_ref[...] += jnp.dot(
        x_ref[...].astype(w_ref.dtype), w_ref[...], preferred_element_type=jnp.float32
    )

    @pl.when(k == pl.num_programs(2) - 1)
    def _():
        y = acc_ref[...] + b_ref[...].astype(jnp.float32)
        o_ref[...] = _apply_activation(y, activation).astype(o_ref.dtype)


def _linear_act_layer(x_p, wt_p, b_p, activation, out_dtype, *, tm):
    """act(x_p @ wt_p + b_p) on pre-padded operands; returns padded (Mp, Np)."""
    mp, kp = x_p.shape
    kp2, np_ = wt_p.shape
    assert kp == kp2, (x_p.shape, wt_p.shape)

    tk = _pick_div_tile(kp, 512)
    tn = _pick_div_tile(np_, 512)
    n_k = kp // tk

    cost = pl.CostEstimate(
        flops=2 * mp * np_ * kp,
        transcendentals=mp * np_ if activation in ("tanh", "sigmoid", "elu") else 0,
        bytes_accessed=(
            mp * kp * x_p.dtype.itemsize
            + kp * np_ * wt_p.dtype.itemsize
            + mp * np_ * jnp.dtype(out_dtype).itemsize
        ),
    )

    if n_k == 1:
        return pl.pallas_call(
            functools.partial(_linear_act_single_k_kernel, activation=activation),
            out_shape=jax.ShapeDtypeStruct((mp, np_), out_dtype),
            grid_spec=pltpu.PrefetchScalarGridSpec(
                num_scalar_prefetch=0,
                grid=(mp // tm, np_ // tn),
                in_specs=[
                    pl.BlockSpec((tm, kp), lambda i, j: (i, 0)),
                    pl.BlockSpec((kp, tn), lambda i, j: (0, j)),
                    pl.BlockSpec((1, tn), lambda i, j: (0, j)),
                ],
                out_specs=pl.BlockSpec((tm, tn), lambda i, j: (i, j)),
            ),
            compiler_params=pltpu.CompilerParams(
                dimension_semantics=("parallel", "parallel"),
            ),
            cost_estimate=cost,
        )(x_p, wt_p, b_p)

    return pl.pallas_call(
        functools.partial(_linear_act_kred_kernel, activation=activation),
        out_shape=jax.ShapeDtypeStruct((mp, np_), out_dtype),
        grid_spec=pltpu.PrefetchScalarGridSpec(
            num_scalar_prefetch=0,
            grid=(mp // tm, np_ // tn, n_k),
            in_specs=[
                pl.BlockSpec((tm, tk), lambda i, j, k: (i, k)),
                pl.BlockSpec(
                    (tk, tn),
                    lambda i, j, k: (k, j),
                    pipeline_mode=pl.Buffered(3),   # weight stream dominates DMA
                ),
                pl.BlockSpec((1, tn), lambda i, j, k: (0, j)),
            ],
            out_specs=pl.BlockSpec((tm, tn), lambda i, j, k: (i, j)),
            scratch_shapes=[pltpu.VMEM((tm, tn), jnp.float32)],
        ),
        compiler_params=pltpu.CompilerParams(
            dimension_semantics=("parallel", "parallel", "arbitrary"),
        ),
        cost_estimate=cost,
    )(x_p, wt_p, b_p)


# ---------------------------------------------------------------------------
# Public forward
# ---------------------------------------------------------------------------

# Stay well under the smallest default scoped-VMEM budget (v5e: 16 MiB).
_FUSED_VMEM_BUDGET = 12 * (1 << 20)


def mlp_forward(state, prepped, activations):
    """Pallas equivalent of MLP.forward on prepared (transposed/padded) params."""
    assert len(prepped) == len(activations)
    M, k0 = state.shape
    out_dtype = state.dtype

    tm = _pick_tm(M)
    mp = _round_up(M, tm)
    k0p = prepped[0][0].shape[0]
    x_p = jnp.pad(state, ((0, mp - M), (0, k0p - k0)))

    n_last = prepped[-1][2]

    if _fused_vmem_bytes(tm, k0p, prepped, out_dtype) <= _FUSED_VMEM_BUDGET:
        out_p = _fused_forward(x_p, prepped, activations, tm=tm, out_dtype=out_dtype)
    else:
        # Chain padded activations; zero K-padding of the next layer's weights
        # keeps padded columns (even sigmoid's 0.5) inert. Slice only at the end.
        h = x_p
        for (wt_p, b_p, _), act in zip(prepped, activations):
            h = _linear_act_layer(h, wt_p, b_p, act, out_dtype, tm=tm)
        out_p = h

    return out_p[:M, :n_last]


# ---------------------------------------------------------------------------
# Reference + demo
# ---------------------------------------------------------------------------

def _mlp_reference(state, params, activations):
    x = state
    for (w, b), act in zip(params, activations):
        x = jnp.dot(x, w.T, precision=jax.lax.Precision.HIGHEST) + b[None, :]
        x = _apply_activation(x, act)
    return x


if __name__ == "__main__":
    key = jax.random.PRNGKey(0)

    # Small MLP consistent with the module: init_size=64, num_of_layers=2,
    # num_of_unit=[128, 32], activation='relu' per layer, batch=256.
    batch = 256
    init_size = 64
    num_of_unit = [128, 32]
    activations = ["relu", "relu"]

    k_state, *k_layers = jax.random.split(key, 1 + 2 * len(num_of_unit))
    state = jax.random.normal(k_state, (batch, init_size), dtype=jnp.float32)

    params = []
    fan_in = init_size
    for li, n_out in enumerate(num_of_unit):
        bound = 1.0 / float(jnp.sqrt(jnp.float32(fan_in)))
        w = jax.random.uniform(
            k_layers[2 * li], (n_out, fan_in), jnp.float32, -bound, bound
        )
        b = jax.random.uniform(
            k_layers[2 * li + 1], (n_out,), jnp.float32, -bound, bound
        )
        params.append((w, b))
        fan_in = n_out

    # One-time parameter prep (transpose + pad + bf16 cast), hoisted out of
    # the forward hot path.
    prepped = prepare_params(params)

    out = mlp_forward(state, prepped, activations)
    out = jax.block_until_ready(out)

    ref = _mlp_reference(state, params, activations)
    ref = jax.block_until_ready(ref)

    assert out.shape == (batch, num_of_unit[-1]), out.shape
    assert jnp.allclose(out, ref, atol=2e-2, rtol=2e-2), (
        float(jnp.max(jnp.abs(out - ref)))
    )

    print("KERNEL_OK")
</pallas_src>

<mosaic_0001>
module attributes {stable_mosaic.version = 11 : i64} {
  func.func @_fused_mlp_kernel(%arg0: i32, %arg1: memref<128x128xf32, #tpu.memory_space<vmem>>, %arg2: memref<128x128xbf16, #tpu.memory_space<vmem>>, %arg3: memref<1x128xf32, #tpu.memory_space<vmem>>, %arg4: memref<128x128xbf16, #tpu.memory_space<vmem>>, %arg5: memref<1x128xf32, #tpu.memory_space<vmem>>, %arg6: memref<128x128xf32, #tpu.memory_space<vmem>>) attributes {dimension_semantics = [#tpu.dimension_semantics<parallel>], iteration_bounds = array<i64: 2>, scalar_prefetch = 0 : i64, scratch_operands = 0 : i64, tpu.core_type = #tpu.core_type<tc>, window_params = [{transform_indices = @transform_0, window_bounds = array<i64: 128, 128>}, {pipeline_mode = #tpu.pipeline_mode<synchronous>, transform_indices = @transform_1, window_bounds = array<i64: 128, 128>}, {pipeline_mode = #tpu.pipeline_mode<synchronous>, transform_indices = @transform_2, window_bounds = array<i64: 1, 128>}, {pipeline_mode = #tpu.pipeline_mode<synchronous>, transform_indices = @transform_3, window_bounds = array<i64: 128, 128>}, {pipeline_mode = #tpu.pipeline_mode<synchronous>, transform_indices = @transform_4, window_bounds = array<i64: 1, 128>}, {transform_indices = @transform_5, window_bounds = array<i64: 128, 128>}]} {
    %c0 = arith.constant 0 : index
    %c0_0 = arith.constant 0 : index
    %0 = vector.load %arg1[%c0, %c0_0] : memref<128x128xf32, #tpu.memory_space<vmem>>, vector<128x128xf32>
    %1 = arith.truncf %0 : vector<128x128xf32> to vector<128x128xbf16>
    %c0_1 = arith.constant 0 : index
    %c0_2 = arith.constant 0 : index
    %2 = vector.load %arg2[%c0_1, %c0_2] : memref<128x128xbf16, #tpu.memory_space<vmem>>, vector<128x128xbf16>
    %cst = arith.constant dense<0.000000e+00> : vector<128x128xf32>
    %3 = tpu.matmul %1, %2, %cst {dimension_numbers = #tpu.dot_dimension_numbers<[1], [0], [0], [1], [0, 0, 1, 1], [], []>} : vector<128x128xbf16>, vector<128x128xbf16>, vector<128x128xf32> -> vector<128x128xf32>
    %c0_3 = arith.constant 0 : index
    %c0_4 = arith.constant 0 : index
    %4 = vector.load %arg3[%c0_3, %c0_4] : memref<1x128xf32, #tpu.memory_space<vmem>>, vector<1x128xf32>
    %5 = vector.broadcast %4 : vector<1x128xf32> to vector<128x128xf32>
    %6 = arith.addf %3, %5 : vector<128x128xf32>
    %cst_5 = arith.constant 0.000000e+00 : f32
    %7 = vector.broadcast %cst_5 : f32 to vector<128x128xf32>
    %8 = arith.maximumf %6, %7 : vector<128x128xf32>
    %9 = arith.truncf %8 : vector<128x128xf32> to vector<128x128xbf16>
    %c0_6 = arith.constant 0 : index
    %c0_7 = arith.constant 0 : index
    %10 = vector.load %arg4[%c0_6, %c0_7] : memref<128x128xbf16, #tpu.memory_space<vmem>>, vector<128x128xbf16>
    %cst_8 = arith.constant dense<0.000000e+00> : vector<128x128xf32>
    %11 = tpu.matmul %9, %10, %cst_8 {dimension_numbers = #tpu.dot_dimension_numbers<[1], [0], [0], [1], [0, 0, 1, 1], [], []>} : vector<128x128xbf16>, vector<128x128xbf16>, vector<128x128xf32> -> vector<128x128xf32>
    %c0_9 = arith.constant 0 : index
    %c0_10 = arith.constant 0 : index
    %12 = vector.load %arg5[%c0_9, %c0_10] : memref<1x128xf32, #tpu.memory_space<vmem>>, vector<1x128xf32>
    %13 = vector.broadcast %12 : vector<1x128xf32> to vector<128x128xf32>
    %14 = arith.addf %11, %13 : vector<128x128xf32>
    %cst_11 = arith.constant 0.000000e+00 : f32
    %15 = vector.broadcast %cst_11 : f32 to vector<128x128xf32>
    %16 = arith.maximumf %14, %15 : vector<128x128xf32>
    %c0_12 = arith.constant 0 : index
    %c0_13 = arith.constant 0 : index
    %17 = vector.load %arg6[%c0_12, %c0_13] : memref<128x128xf32, #tpu.memory_space<vmem>>, vector<128x128xf32>
    tpu.vector_store %arg6[%c0_12, %c0_13], %16 {strides = array<i32>} : memref<128x128xf32, #tpu.memory_space<vmem>>, vector<128x128xf32>,
    return
  }
  func.func @transform_0(%arg0: i32) -> (i32, i32) {
    %c0_i32 = arith.constant 0 : i32
    %c0_i32_0 = arith.constant 0 : i32
    return %arg0, %c0_i32 : i32, i32
  }
  func.func @transform_1(%arg0: i32) -> (i32, i32) {
    %c0_i32 = arith.constant 0 : i32
    %c0_i32_0 = arith.constant 0 : i32
    %c0_i32_1 = arith.constant 0 : i32
    return %c0_i32, %c0_i32_0 : i32, i32
  }
  func.func @transform_2(%arg0: i32) -> (i32, i32) {
    %c0_i32 = arith.constant 0 : i32
    %c0_i32_0 = arith.constant 0 : i32
    %c0_i32_1 = arith.constant 0 : i32
    return %c0_i32, %c0_i32_0 : i32, i32
  }
  func.func @transform_3(%arg0: i32) -> (i32, i32) {
    %c0_i32 = arith.constant 0 : i32
    %c0_i32_0 = arith.constant 0 : i32
    %c0_i32_1 = arith.constant 0 : i32
    return %c0_i32, %c0_i32_0 : i32, i32
  }
  func.func @transform_4(%arg0: i32) -> (i32, i32) {
    %c0_i32 = arith.constant 0 : i32
    %c0_i32_0 = arith.constant 0 : i32
    %c0_i32_1 = arith.constant 0 : i32
    return %c0_i32, %c0_i32_0 : i32, i32
  }
  func.func @transform_5(%arg0: i32) -> (i32, i32) {
    %c0_i32 = arith.constant 0 : i32
    %c0_i32_0 = arith.constant 0 : i32
    return %arg0, %c0_i32 : i32, i32
  }
}

</mosaic_0001>

<bundles_post_ra>
// kernel: tpu_custom_call.1
= control target key start
LH: loop header
LB: loop body
LE: loop exit
PB: predicated region body
PF: predicated region fallthrough
CT: control target
= control target key end

     0   :  { %10 = vsyncpa [#allocation3], 0  ;;  %s1463_s0 = inlined_call_operand.hbm [shape: f32[256,128], index: 0, kind: input, shape index: {}]   ;;  %s1464_s1 = inlined_call_operand.hbm [shape: bf16[128,128], index: 1, kind: input, shape index: {}]   ;;  %s1465_s2 = inlined_call_operand.vmem [shape: f32[1,128], index: 2, kind: input, shape index: {}]   ;;  %s1466_s3 = inlined_call_operand.hbm [shape: bf16[128,128], index: 3, kind: input, shape index: {}]   ;;  %s1467_s4 = inlined_call_operand.vmem [shape: f32[1,128], index: 4, kind: input, shape index: {}]   ;;  %s1468_s5 = inlined_call_operand.hbm [shape: f32[256,128], index: 5, kind: output, shape index: {}]  }
   0x1   :  { %12 = vsyncpa [#allocation3 + $0x1], 0 }
   0x2   :  { %13 = vsyncpa [#allocation6], 0 }
   0x3   :  { %14 = vsyncpa [#allocation4], 0 }
   0x4   :  { %16 = vsyncpa [#allocation4 + $0x1], 0  ;;  %s1210_s18 = smov 0   ;;  %s1212_s19 = smov 0  }
   0x5   :  { %s1214_s20 = smov 0   ;;  %s1216_s21 = smov 0  }
   0x6 LB: > { %s1231_s22 = sadd.s32 4294967295, %s1168_s21   ;;  %s797_s23 = sadd.s32 4294967294, %s1168_s21   ;;  %s1168_s21 = sphi %s1216_s21, %s1490_s21   ;;  %s1164_s20 = sphi %s1214_s20, %s1489_s20   ;;  %s1160_s19 = sphi %s1212_s19, %s1488_s19   ;;  %s1156_s18 = sphi %s1210_s18, %s1487_s18  }
   0x7   : > { %p42_p0 = scmp.ne.s32.totalorder %s1160_s19, %s1156_s18  ;;  %p1469_p1 = scmp.eq.s32.totalorder %s1231_s22, 0 }
   0x8   : > { %p156_p3 = scmp.eq.s32.totalorder %s797_s23, 1  ;;  %p798_p5 = scmp.ge.s32.totalorder %s1168_s21, 1 }
   0x9   : > { %p1240_p4 = por %p1469_p1, %p42_p0  ;;  %p163_p7 = scmp.lt.s32.totalorder %s1168_s21, 3 }
   0xa   : > { %p1245_p6 = por %p156_p3, %p42_p0  ;;  %s1170_s27 = smov [#allocation5]  }
   0xb   : > { %s1473_s24 = scalar_select %p1240_p4, 1, 0 }
   0xc   : > { %s1474_s25 = scalar_select %p1245_p6, 1, 0 }
   0xd   : > { %p1250_p8 = pnand %p798_p5, %p163_p7  ;;  %s175_s28 = sshll.u32 %s1170_s27, 4  ;;  %s176_s28 = int_to_ptr.vmem [resolvable:$true] %s175_s28 }
   0xe   : > { %s1171_s30 = smov [#allocation7]   ;;  %s1031_s7 = scalar_lea.vmem %s176_s28, 1024 }
   0xf   : > { %s1475_s26 = scalar_select %p1250_p8, 1, 0 }
  0x10   : > { %p943_p9 = pneg %p1250_p8  ;;  %s191_s6 = sshll.u32 %s1171_s30, 4  ;;  %s192_s6 = int_to_ptr.vmem [resolvable:$true] %s191_s6 }
  0x11   : > { %p1032_p13 = scmp.ne.s32.totalorder %s176_s28, %s1031_s7  ;;  %p1039_p5 = scmp.lt.s32.totalorder %s176_s28, %s176_s28 }
  0x12   : > { %p1259_p11 = pnand %p943_p9, %p1469_p1  ;;  %p1040_p7 = scmp.lt.s32.totalorder %s1031_s7, %s1031_s7 }
  0x14   : > { %p1022_p12 = pneg %p1259_p11  ;;  %p1041_p10 = por %p1040_p7, %p1039_p5 }
  0x16   : > { %p1034_p0 = pnand %p1032_p13, %p1022_p12 }
  0x18   : > { %p1035_p3 = pneg %p1034_p0 }
  0x1a   : > { %p1042_p9 = pnand %p1041_p10, %p1035_p3 }
  0x1c   : > { %1045 = shalt.err (!%p1042_p9)
}
  0x1d   : > { %s1172_s8 = smov 64   ;;  %s1173_s9 = smov 4  }
  0x1e   : > { %946 = dma.hbm_to_vmem [thread:$0]  (!%p1259_p11), %s1464_s1, 1024, %s176_s28, [#allocation6], %s1172_s8, %s1172_s8, %s1173_s9  }
  0x1f   : > { %s1057_s12 = scalar_lea.vmem %s192_s6, 1024  ;;  %p1065_p2 = scmp.lt.s32.totalorder %s192_s6, %s192_s6 }
  0x20   : > { %p1058_p1 = scmp.ne.s32.totalorder %s192_s6, %s1057_s12  ;;  %p1066_p6 = scmp.lt.s32.totalorder %s1057_s12, %s1057_s12 }
  0x22   : > { %p1060_p13 = pnand %p1058_p1, %p1022_p12  ;;  %p1067_p5 = por %p1066_p6, %p1065_p2 }
  0x24   : > { %p1061_p0 = pneg %p1060_p13 }
  0x26   : > { %p1068_p10 = pnand %p1067_p5, %p1061_p0 }
  0x28   : > { %1071 = shalt.err (!%p1068_p10)
}
  0x29   : > { %949 = dma.hbm_to_vmem [thread:$0]  (!%p1259_p11), %s1466_s3, 1024, %s192_s6, [#allocation6], %s1172_s8, %s1172_s8, %s1173_s9  }
  0x2a   : > { %s1282_s15 = sadd.s32 1, %s1168_s21   ;;  %s29_s16 = sadd.s32 1, %s1164_s20 }
  0x2b   : > { %s26_s17 = ssub.s32 %s1168_s21, %s1282_s15  ;;  %p36_p1 = scmp.ne.s32.totalorder %s1164_s20, %s1160_s19 }
  0x2c   : > { %p27_p2 = scmp.eq.s32.totalorder %s26_s17, 0  ;;  %p37_p6 = scmp.eq.s32.totalorder %s1168_s21, 0 }
  0x2d   : > { %p1477_p12 = scmp.eq.s32.totalorder %s1231_s22, 1  ;;  %p960_p7 = scmp.lt.s32.totalorder %s1168_s21, 2 }
  0x2e   : > { %s1298_s27 = scalar_select %p27_p2, %s1164_s20, %s29_s16  }
  0x2f   : > { %p1292_p3 = por %p1477_p12, %p36_p1  ;;  %p38_p9 = por %p37_p6, %p36_p1 }
  0x30   : > { %s208_s28 = sand.u32 1, %s1164_s20   ;;  %s833_s30 = sshll.u32 %s1168_s21, 11 }
  0x31   : > { %s1478_s23 = scalar_select %p1292_p3, 1, 0 }
  0x32   : > { %s802_s29 = sshll.u32 %s208_s28, 7  ;;  %s1305_s8 = scalar_lea.hbm %s1463_s0, %s833_s30 }
  0x33   : > { %s212_s9 = scalar_lea.vmem [#allocation2], %s802_s29  ;;  %p1309_p11 = pnand %p960_p7, %p38_p9 }
  0x34   : > { %s219_s10 = sshll.u32 %s212_s9, 4  ;;  %s1313_s12 = scalar_lea.sflag [#allocation3], %s208_s28  ;;  %s1307_s10 = int_to_ptr.vmem [resolvable:$true] %s219_s10 }
  0x35   : > { %s1072_s13 = scalar_lea.hbm %s1305_s8, 2048  ;;  %p1074_p0 = pneg %p1309_p11 }
  0x36   : > { %p1073_p13 = scmp.ne.s32.totalorder %s1305_s8, %s1072_s13  ;;  %s1077_s17 = scalar_lea.hbm %s1463_s0, 4096 }
  0x37   : > { %p1078_p1 = scmp.lt.s32.totalorder %s1305_s8, %s1463_s0  ;;  %p1079_p2 = scmp.lt.s32.totalorder %s1077_s17, %s1072_s13 }
  0x38   : > { %p1075_p5 = pnand %p1074_p0, %p1073_p13 }
  0x39   : > { %p1080_p6 = por %p1079_p2, %p1078_p1 }
  0x3a   : > { %p1076_p10 = pneg %p1075_p5 }
  0x3c   : > { %p1081_p12 = pnand %p1080_p6, %p1076_p10 }
  0x3e   : > { %1084 = shalt.err (!%p1081_p12)
}
  0x3f   : > { %s1085_s28 = scalar_lea.vmem %s1307_s10, 2048  ;;  %s1174_s6 = smov [#allocation2]  }
  0x40   : > { %p1086_p7 = scmp.ne.s32.totalorder %s1307_s10, %s1085_s28  ;;  %s1090_s7 = sshll.u32 %s1174_s6, 4  ;;  %s1091_s7 = int_to_ptr.vmem [resolvable:$false] %s1090_s7 }
  0x41   : > { %s1092_s9 = scalar_lea.vmem %s1091_s7, 4096  ;;  %p1093_p5 = scmp.lt.s32.totalorder %s1307_s10, %s1091_s7 }
  0x42   : > { %p1088_p9 = pnand %p1086_p7, %p1074_p0  ;;  %p1094_p3 = scmp.lt.s32.totalorder %s1092_s9, %s1085_s28 }
  0x44   : > { %p1089_p13 = pneg %p1088_p9  ;;  %p1095_p4 = por %p1094_p3, %p1093_p5 }
  0x46   : > { %p1096_p8 = pnand %p1095_p4, %p1089_p13 }
  0x48   : > { %1099 = shalt.err (!%p1096_p8)
}
  0x49   : > { %s1175_s13 = smov 128   ;;  %s1176_s14 = smov 8  }
  0x4a   : > { %953 = dma.hbm_to_vmem [thread:$0]  (!%p1309_p11), %s1305_s8, 2048, %s1307_s10, %s1313_s12, %s1175_s13, %s1175_s13, %s1176_s14  }
  0x4b   : > { %p1480_p0 = scmp.ne.s32.totalorder %s1475_s26, 0 }
  0x4c   : > { %s1337_s16 = sand.u32 (!%p1480_p0), 1, %s1160_s19   ;;  %p1481_p4 = scmp.ne.s32.totalorder (!%p1480_p0), %s1473_s24, 0 }
  0x4d   : > { %231 = sbr.rel (%p1480_p0) target bundleno = 566 (0x236), region = 40  ;;  %s806_s17 = sshll.u32 (!%p1480_p0), %s1337_s16, 7 }
  0x4e   : > { %s234_s29 = scalar_lea.sflag (!%p1480_p0), [#allocation3], %s1337_s16  ;;  %s1343_s30 = scalar_lea.vmem (!%p1480_p0), [#allocation2], %s806_s17 }
  0x52   : > { %1143 = dma.done.wait (%p1481_p4), %s234_s29, 2048  }
  0x53   : > { %1145 = vsyncadd (%p1481_p4), %s234_s29, 4294965248  ;;  %p1482_p8 = scmp.eq.s32.totalorder %s1231_s22, 0 }
  0x55   : > { %1147 = dma.done.wait (%p1482_p8), [#allocation6], 2048   ;;  %p1483_p3 = pmov %p1482_p8 }
  0x56   : > { %v1004_v0 = vld [vmem:[#allocation5 + $0x38] sm:$0xff]   ;;  %v1005_v1 = vld [vmem:[#allocation5 + $0x30] sm:$0xff]   ;;  %v1006_v2 = vld [vmem:[#allocation5 + $0x28] sm:$0xff]   ;;  %s1381_s11 = scalar_lea.vmem [#allocation8], %s806_s17  ;;  %s834_s12 = sshll.u32 %s1231_s22, 11 }
  0x57   : > { %1149 = vsyncadd (%p1483_p3), [#allocation6], 4294965248  ;;  %867 = vmatprep.subr.bf16.mxu0 %v1004_v0  ;;  %v1007_v3 = vld [vmem:[#allocation5 + $0x20] sm:$0xff]   ;;  %v276_v5 = vld [vmem:[%s1343_s30 + $0x8] sm:$0xff]  ;;  %s705_s28 = sshll.u32 %s1381_s11, 4  ;;  %s1416_s9 = scalar_lea.hbm %s1468_s5, %s834_s12  ;;  %s1418_s28 = int_to_ptr.vmem [resolvable:$true] %s705_s28 }
  0x58   : > { %868 = vmatpush3.bf16.msra.mxu0 %v1004_v0  ;;  %v275_v4 = vld [vmem:[%s1343_s30] sm:$0xff]  ;;  %v1008_v7 = vld [vmem:[#allocation5 + $0x18] sm:$0xff]   ;;  %v1013_v9 = vld [vmem:[#allocation7 + $0x30] sm:$0xff]   ;;  %s692_s22 = scalar_lea.sflag [#allocation4], %s1337_s16  ;;  %s1100_s13 = scalar_lea.vmem %s1418_s28, 2048 }
  0x59   : > { %869 = vmatprep.subr.bf16.mxu0 %v1005_v1  ;;  %v291_v6 = vpack.c.bf16 %v276_v5, %v275_v4  ;;  %v1012_v8 = vld [vmem:[#allocation7 + $0x38] sm:$0xff]   ;;  %v1009_v10 = vld [vmem:[#allocation5 + $0x10] sm:$0xff]   ;;  %v1014_v11 = vld [vmem:[#allocation7 + $0x28] sm:$0xff]   ;;  %p1101_p11 = scmp.ne.s32.totalorder %s1418_s28, %s1100_s13  ;;  %p1484_p10 = scmp.ne.s32.totalorder %s1478_s23, 0 }
  0x5a   : > { %899 = vmatprep.subr.bf16.mxu1 %v1012_v8  ;;  %v1010_v12 = vld [vmem:[#allocation5 + $0x8] sm:$0xff]   ;;  %v1015_v13 = vld [vmem:[#allocation7 + $0x20] sm:$0xff]   ;;  %v1016_v15 = vld [vmem:[#allocation7 + $0x18] sm:$0xff]   ;;  %s1177_s14 = smov [#allocation8]  }
  0x5b   : > { %883 = vmatprep.mubr.bf16.mxu0 %v291_v6  ;;  %900 = vmatpush3.bf16.msra.mxu1 %v1012_v8  ;;  %v1011_v14 = vld [vmem:[#allocation5] sm:$0xff]   ;;  %v277_v16 = vld [vmem:[%s1343_s30 + $0x10] sm:$0xff]  ;;  %v278_v17 = vld [vmem:[%s1343_s30 + $0x18] sm:$0xff]  ;;  %p1102_p1 = pnand %p1101_p11, %p1484_p10  ;;  %s1104_s17 = sshll.u32 %s1177_s14, 4  ;;  %s1105_s17 = int_to_ptr.vmem [resolvable:$false] %s1104_s17 }
  0x5c   : > { %870 = vmatpush3.bf16.msra.mxu0 %v1005_v1  ;;  %901 = vmatprep.subr.bf16.mxu1 %v1013_v9  ;;  %v279_v18 = vld [vmem:[%s1343_s30 + $0x20] sm:$0xff]  ;;  %v280_v19 = vld [vmem:[%s1343_s30 + $0x28] sm:$0xff]  ;;  %v292_v20 = vpack.c.bf16 %v278_v17, %v277_v16  ;;  %v281_v22 = vld [vmem:[%s1343_s30 + $0x30] sm:$0xff]  ;;  %s1106_s29 = scalar_lea.vmem %s1105_s17, 4096  ;;  %p1107_p6 = scmp.lt.s32.totalorder %s1418_s28, %s1105_s17 }
  0x5d   : > { %871 = vmatprep.subr.bf16.mxu0 %v1006_v2  ;;  %v293_v21 = vpack.c.bf16 %v280_v19, %v279_v18  ;;  %v282_v23 = vld [vmem:[%s1343_s30 + $0x38] sm:$0xff]  ;;  %v283_v24 = vld [vmem:[%s1343_s30 + $0x40] sm:$0xff]  ;;  %v284_v25 = vld [vmem:[%s1343_s30 + $0x48] sm:$0xff]  ;;  %p1103_p2 = pneg %p1102_p1  ;;  %p1108_p12 = scmp.lt.s32.totalorder %s1106_s29, %s1100_s13 }
  0x5e   : > { %v294_v26 = vpack.c.bf16 %v282_v23, %v281_v22  ;;  %v295_v27 = vpack.c.bf16 %v284_v25, %v283_v24  ;;  %v285_v28 = vld [vmem:[%s1343_s30 + $0x50] sm:$0xff]  ;;  %v286_v29 = vld [vmem:[%s1343_s30 + $0x58] sm:$0xff]  ;;  %v287_v30 = vld [vmem:[%s1343_s30 + $0x60] sm:$0xff] }
  0x5f   : > { %902 = vmatpush3.bf16.msra.mxu1 %v1013_v9  ;;  %v288_v31 = vld [vmem:[%s1343_s30 + $0x68] sm:$0xff]  ;;  %v296_v32 = vpack.c.bf16 %v286_v29, %v285_v28  ;;  %v289_v34 = vld [vmem:[%s1343_s30 + $0x70] sm:$0xff]  ;;  %v290_v35 = vld [vmem:[%s1343_s30 + $0x78] sm:$0xff]  ;;  %p1109_p7 = por %p1108_p12, %p1107_p6 }
  0x60   : > { %872 = vmatpush3.bf16.msra.mxu0 %v1006_v2  ;;  %903 = vmatprep.subr.bf16.mxu1 %v1014_v11  ;;  %v297_v33 = vpack.c.bf16 %v288_v31, %v287_v30  ;;  %v298_v36 = vpack.c.bf16 %v290_v35, %v289_v34  ;;  %v1017_v37 = vld [vmem:[#allocation7 + $0x10] sm:$0xff]   ;;  %v1018_v38 = vld [vmem:[#allocation7 + $0x8] sm:$0xff]   ;;  %v1019_v39 = vld [vmem:[#allocation7] sm:$0xff]  }
  0x61   : > { %873 = vmatprep.subr.bf16.mxu0 %v1007_v3  ;;  %v810_v42 = vld [vmem:[%s1465_s2] ss:$0 sm:$0xff]  ;;  %p1110_p9 = pnand %p1109_p7, %p1103_p2 }
  0x63   : > { %904 = vmatpush3.bf16.msra.mxu1 %v1014_v11 }
  0x64   : > { %874 = vmatpush3.bf16.msra.mxu0 %v1007_v3  ;;  %905 = vmatprep.subr.bf16.mxu1 %v1015_v13 }
  0x65   : > { %875 = vmatprep.subr.bf16.mxu0 %v1008_v7 }
  0x67   : > { %906 = vmatpush3.bf16.msra.mxu1 %v1015_v13 }
  0x68   : > { %876 = vmatpush3.bf16.msra.mxu0 %v1008_v7  ;;  %907 = vmatprep.subr.bf16.mxu1 %v1016_v15 }
  0x69   : > { %877 = vmatprep.subr.bf16.mxu0 %v1009_v10 }
  0x6b   : > { %908 = vmatpush3.bf16.msra.mxu1 %v1016_v15 }
  0x6c   : > { %878 = vmatpush3.bf16.msra.mxu0 %v1009_v10  ;;  %909 = vmatprep.subr.bf16.mxu1 %v1017_v37 }
  0x6d   : > { %879 = vmatprep.subr.bf16.mxu0 %v1010_v12 }
  0x6f   : > { %910 = vmatpush3.bf16.msra.mxu1 %v1017_v37 }
  0x70   : > { %880 = vmatpush3.bf16.msra.mxu0 %v1010_v12  ;;  %911 = vmatprep.subr.bf16.mxu1 %v1018_v38 }
  0x71   : > { %881 = vmatprep.subr.bf16.mxu0 %v1011_v14 }
  0x73   : > { %912 = vmatpush3.bf16.msra.mxu1 %v1018_v38 }
  0x74   : > { %882 = vmatpush3.bf16.msra.mxu0 %v1011_v14  ;;  %913 = vmatprep.subr.bf16.mxu1 %v1019_v39 }
  0x77   : > { %884 = vmatmul.mubr.bf16.vlgmr.msra.gmra.mxu0 %v292_v20  ;;  %914 = vmatpush3.bf16.msra.mxu1 %v1019_v39 }
  0x78   : > { %887 = vmatprep.mubr.bf16.mxu0 %v293_v21 }
  0x7f   : > { %888 = vmatmul.mubr.bf16.gmra.mxu0 %v294_v26 }
  0x80   : > { %891 = vmatprep.mubr.bf16.mxu0 %v295_v27 }
  0x87   : > { %892 = vmatmul.mubr.bf16.gmra.mxu0 %v296_v32 }
  0x88   : > { %895 = vmatprep.mubr.bf16.mxu0 %v297_v33  ;;  %v1375_v33 = vld [vmem:[%s1467_s4] ss:$0 sm:$0xff] }
  0x8f   : > { %896 = vmatmul.mubr.bf16.gmra.mxu0 %v298_v36 }
 0x137   : > { %v885_v40 = vpop.f32.mrf.mxu0 }
 0x138   : > { %v413_v46 = vadd.f32 %v885_v40, %v810_v42 }
 0x139   : > { %v404_v41 = vpop.f32.mrf.mxu0 }
 0x13a   : > { %v405_v44 = vadd.f32 %v810_v42, %v404_v41  ;;  %v469_v53 = vmax.f32 %v413_v46, 0.0 }
 0x13b   : > { %v886_v43 = vpop.f32.mrf.mxu0 }
 0x13c   : > { %v416_v45 = vadd.f32 %v886_v43, %v810_v42  ;;  %v467_v51 = vmax.f32 %v405_v44, 0.0 }
 0x13d   : > { %v407_v47 = vpop.f32.mrf.mxu0 }
 0x13e   : > { %v408_v48 = vadd.f32 %v810_v42, %v407_v47  ;;  %v470_v49 = vmax.f32 %v416_v45, 0.0 }
 0x13f   : > { %v889_v50 = vpop.f32.mrf.mxu0 }
 0x140   : > { %v468_v52 = vmax.f32 %v408_v48, 0.0  ;;  %v484_v56 = vpack.c.bf16 %v470_v49, %v469_v53  ;;  %v429_v60 = vadd.f32 %v889_v50, %v810_v42 }
 0x141   : > { %v420_v54 = vpop.f32.mrf.mxu0 }
 0x142   : > { %v483_v55 = vpack.c.bf16 %v468_v52, %v467_v51  ;;  %v421_v58 = vadd.f32 %v810_v42, %v420_v54  ;;  %v473_v3 = vmax.f32 %v429_v60, 0.0 }
 0x143   : > { %v890_v57 = vpop.f32.mrf.mxu0 }
 0x144   : > { %v432_v59 = vadd.f32 %v890_v57, %v810_v42  ;;  %915 = vmatprep.mubr.bf16.mxu1 %v483_v55  ;;  %v471_v1 = vmax.f32 %v421_v58, 0.0 }
 0x145   : > { %v423_v61 = vpop.f32.mrf.mxu0  ;;  %916 = vmatmul.mubr.bf16.vlgmr.msra.gmra.mxu1 %v484_v56 }
 0x146   : > { %v424_v62 = vadd.f32 %v810_v42, %v423_v61  ;;  %v474_v63 = vmax.f32 %v432_v59, 0.0 }
 0x147   : > { %v893_v0 = vpop.f32.mrf.mxu0 }
 0x148   : > { %v472_v2 = vmax.f32 %v424_v62, 0.0  ;;  %v486_v6 = vpack.c.bf16 %v474_v63, %v473_v3  ;;  %v445_v10 = vadd.f32 %v893_v0, %v810_v42 }
 0x149   : > { %v436_v4 = vpop.f32.mrf.mxu0 }
 0x14a   : > { %v485_v5 = vpack.c.bf16 %v472_v2, %v471_v1  ;;  %v437_v8 = vadd.f32 %v810_v42, %v436_v4  ;;  %v477_v17 = vmax.f32 %v445_v10, 0.0 }
 0x14b   : > { %v894_v7 = vpop.f32.mrf.mxu0 }
 0x14c   : > { %v448_v9 = vadd.f32 %v894_v7, %v810_v42  ;;  %919 = vmatprep.mubr.bf16.mxu1 %v485_v5  ;;  %v475_v15 = vmax.f32 %v437_v8, 0.0 }
 0x14d   : > { %v439_v11 = vpop.f32.mrf.mxu0  ;;  %920 = vmatmul.mubr.bf16.gmra.mxu1 %v486_v6 }
 0x14e   : > { %v440_v12 = vadd.f32 %v810_v42, %v439_v11  ;;  %v478_v13 = vmax.f32 %v448_v9, 0.0 }
 0x14f   : > { %v897_v14 = vpop.f32.mrf.mxu0 }
 0x150   : > { %v476_v16 = vmax.f32 %v440_v12, 0.0  ;;  %v488_v20 = vpack.c.bf16 %v478_v13, %v477_v17  ;;  %v461_v24 = vadd.f32 %v897_v14, %v810_v42 }
 0x151   : > { %v452_v18 = vpop.f32.mrf.mxu0 }
 0x152   : > { %v487_v19 = vpack.c.bf16 %v476_v16, %v475_v15  ;;  %v453_v22 = vadd.f32 %v810_v42, %v452_v18  ;;  %v481_v30 = vmax.f32 %v461_v24, 0.0 }
 0x153   : > { %v898_v21 = vpop.f32.mrf.mxu0 }
 0x154   : > { %v464_v23 = vadd.f32 %v898_v21, %v810_v42  ;;  %923 = vmatprep.mubr.bf16.mxu1 %v487_v19  ;;  %v479_v28 = vmax.f32 %v453_v22, 0.0 }
 0x155   : > { %v455_v25 = vpop.f32.mrf.mxu0  ;;  %924 = vmatmul.mubr.bf16.gmra.mxu1 %v488_v20 }
 0x156   : > { %v456_v26 = vadd.f32 %v810_v42, %v455_v25  ;;  %v482_v27 = vmax.f32 %v464_v23, 0.0 }
 0x158   : > { %v480_v29 = vmax.f32 %v456_v26, 0.0  ;;  %v490_v32 = vpack.c.bf16 %v482_v27, %v481_v30 }
 0x15a   : > { %v489_v31 = vpack.c.bf16 %v480_v29, %v479_v28 }
 0x15c   : > { %927 = vmatprep.mubr.bf16.mxu1 %v489_v31 }
 0x15d   : > { %928 = vmatmul.mubr.bf16.gmra.mxu1 %v490_v32 }
 0x205   : > { %v917_v34 = vpop.f32.mrf.mxu1 }
 0x206   : > { %v605_v35 = vadd.f32 %v917_v34, %v1375_v33 }
 0x207   : > { %v596_v36 = vpop.f32.mrf.mxu1 }
 0x208   : > { %v661_v37 = vmax.f32 %v605_v35, 0.0  ;;  %v597_v38 = vadd.f32 %v1375_v33, %v596_v36 }
 0x209   : > { %v918_v39 = vpop.f32.mrf.mxu1 }
 0x20a   : > { %677 = vst [vmem:[%s1381_s11 + $0x10] sm:$0xff] %v661_v37  ;;  %v659_v40 = vmax.f32 %v597_v38, 0.0  ;;  %v608_v41 = vadd.f32 %v918_v39, %v1375_v33 }
 0x20b   : > { %v599_v42 = vpop.f32.mrf.mxu1 }
 0x20c   : > { %675 = vst [vmem:[%s1381_s11] sm:$0xff] %v659_v40  ;;  %v662_v43 = vmax.f32 %v608_v41, 0.0  ;;  %v600_v44 = vadd.f32 %v1375_v33, %v599_v42 }
 0x20d   : > { %v921_v45 = vpop.f32.mrf.mxu1 }
 0x20e   : > { %678 = vst [vmem:[%s1381_s11 + $0x18] sm:$0xff] %v662_v43  ;;  %v660_v46 = vmax.f32 %v600_v44, 0.0  ;;  %v621_v47 = vadd.f32 %v921_v45, %v1375_v33 }
 0x20f   : > { %v612_v48 = vpop.f32.mrf.mxu1 }
 0x210   : > { %676 = vst [vmem:[%s1381_s11 + $0x8] sm:$0xff] %v660_v46  ;;  %v665_v49 = vmax.f32 %v621_v47, 0.0  ;;  %v613_v50 = vadd.f32 %v1375_v33, %v612_v48 }
 0x211   : > { %v922_v51 = vpop.f32.mrf.mxu1 }
 0x212   : > { %681 = vst [vmem:[%s1381_s11 + $0x30] sm:$0xff] %v665_v49  ;;  %v663_v52 = vmax.f32 %v613_v50, 0.0  ;;  %v624_v53 = vadd.f32 %v922_v51, %v1375_v33 }
 0x213   : > { %v615_v54 = vpop.f32.mrf.mxu1 }
 0x214   : > { %679 = vst [vmem:[%s1381_s11 + $0x20] sm:$0xff] %v663_v52  ;;  %v666_v55 = vmax.f32 %v624_v53, 0.0  ;;  %v616_v56 = vadd.f32 %v1375_v33, %v615_v54 }
 0x215   : > { %v925_v57 = vpop.f32.mrf.mxu1 }
 0x216   : > { %682 = vst [vmem:[%s1381_s11 + $0x38] sm:$0xff] %v666_v55  ;;  %v664_v58 = vmax.f32 %v616_v56, 0.0  ;;  %v637_v59 = vadd.f32 %v925_v57, %v1375_v33 }
 0x217   : > { %v628_v60 = vpop.f32.mrf.mxu1 }
 0x218   : > { %680 = vst [vmem:[%s1381_s11 + $0x28] sm:$0xff] %v664_v58  ;;  %v669_v61 = vmax.f32 %v637_v59, 0.0  ;;  %v629_v62 = vadd.f32 %v1375_v33, %v628_v60 }
 0x219   : > { %v926_v63 = vpop.f32.mrf.mxu1 }
 0x21a   : > { %685 = vst [vmem:[%s1381_s11 + $0x50] sm:$0xff] %v669_v61  ;;  %v667_v0 = vmax.f32 %v629_v62, 0.0  ;;  %v640_v1 = vadd.f32 %v926_v63, %v1375_v33 }
 0x21b   : > { %v631_v2 = vpop.f32.mrf.mxu1 }
 0x21c   : > { %683 = vst [vmem:[%s1381_s11 + $0x40] sm:$0xff] %v667_v0  ;;  %v670_v3 = vmax.f32 %v640_v1, 0.0  ;;  %v632_v4 = vadd.f32 %v1375_v33, %v631_v2 }
 0x21d   : > { %v929_v5 = vpop.f32.mrf.mxu1 }
 0x21e   : > { %686 = vst [vmem:[%s1381_s11 + $0x58] sm:$0xff] %v670_v3  ;;  %v668_v6 = vmax.f32 %v632_v4, 0.0  ;;  %v653_v7 = vadd.f32 %v929_v5, %v1375_v33 }
 0x21f   : > { %v644_v8 = vpop.f32.mrf.mxu1 }
 0x220   : > { %684 = vst [vmem:[%s1381_s11 + $0x48] sm:$0xff] %v668_v6  ;;  %v673_v9 = vmax.f32 %v653_v7, 0.0  ;;  %v645_v10 = vadd.f32 %v1375_v33, %v644_v8 }
 0x221   : > { %v930_v11 = vpop.f32.mrf.mxu1 }
 0x222   : > { %689 = vst [vmem:[%s1381_s11 + $0x70] sm:$0xff] %v673_v9  ;;  %v671_v12 = vmax.f32 %v645_v10, 0.0  ;;  %v656_v13 = vadd.f32 %v930_v11, %v1375_v33 }
 0x223   : > { %v647_v14 = vpop.f32.mrf.mxu1 }
 0x224   : > { %687 = vst [vmem:[%s1381_s11 + $0x60] sm:$0xff] %v671_v12  ;;  %v674_v15 = vmax.f32 %v656_v13, 0.0  ;;  %v648_v16 = vadd.f32 %v1375_v33, %v647_v14 }
 0x226   : > { %690 = vst [vmem:[%s1381_s11 + $0x78] sm:$0xff] %v674_v15  ;;  %v672_v17 = vmax.f32 %v648_v16, 0.0 }
 0x228   : > { %688 = vst [vmem:[%s1381_s11 + $0x68] sm:$0xff] %v672_v17 }
 0x229   : > { %1113 = shalt.err (!%p1110_p9)
}
 0x22a   : > { %s1114_s30 = scalar_lea.hbm %s1416_s9, 2048  ;;  %s1118_s8 = scalar_lea.hbm %s1468_s5, 4096 }
 0x22b   : > { %p1115_p13 = scmp.ne.s32.totalorder %s1416_s9, %s1114_s30  ;;  %p1119_p4 = scmp.lt.s32.totalorder %s1416_s9, %s1468_s5 }
 0x22c   : > { %p1120_p8 = scmp.lt.s32.totalorder %s1118_s8, %s1114_s30 }
 0x22d   : > { %p1116_p5 = pnand %p1115_p13, %p1484_p10 }
 0x22e   : > { %p1121_p3 = por %p1120_p8, %p1119_p4 }
 0x22f   : > { %p1117_p0 = pneg %p1116_p5 }
 0x231   : > { %p1122_p11 = pnand %p1121_p3, %p1117_p0 }
 0x233   : > { %1125 = shalt.err (!%p1122_p11)
}
 0x234   : > { %s1178_s12 = smov 128   ;;  %s1179_s6 = smov 8  }
 0x235   : > { %941 = dma.vmem_to_hbm [thread:$0]  (%p1484_p10), %s1418_s28, 2048, %s1416_s9, %s692_s22, %s1178_s12, %s1178_s12, %s1179_s6  }
 0x236 PF: > { %s720_s7 = sand.u32 1, %s1156_s18   ;;  %p1485_p1 = scmp.ne.s32.totalorder %s1474_s25, 0 }
 0x237   : > { %p1486_p2 = scmp.ge.s32.totalorder %s1168_s21, 2  ;;  %s721_s13 = scalar_lea.sflag [#allocation4], %s720_s7 }
 0x239   : > { %p955_p6 = pnand %p1486_p2, %p1485_p1 }
 0x23b   : > { %p956_p12 = pneg %p955_p6 }
 0x23d   : > { %1151 = dma.done.wait (%p956_p12), %s721_s13, 2048  }
 0x23e   : > { %1153 = vsyncadd (%p956_p12), %s721_s13, 4294965248  ;;  %p19_p7 = scmp.ge.s32.totalorder %s1282_s15, 4   ;;  %s1487_s18 = smov %s1160_s19 }
 0x23f   : > { %s1488_s19 = smov %s1164_s20  ;;  %s1489_s20 = smov %s1298_s27 }
 0x240   : > { %s1490_s21 = smov %s1282_s15  ;;  %21 = sbr.rel (!%p19_p7) target bundleno = 6 (0x6), region = 93 }
 0x245   :  { %726 = vsyncpa [#allocation3], 1 }
 0x246   :  { %728 = vsyncpa [#allocation3 + $0x1], 1 }
 0x247   :  { %729 = vsyncpa [#allocation6], 1 }
 0x248   :  { %730 = vsyncpa [#allocation4], 1 }
 0x249   :  { %732 = vsyncpa [#allocation4 + $0x1], 1 }

</bundles_post_ra>
